<compile_context>
chip_gen: v6e
topology: v6e:2x2x1
jax: 0.10.0
libtpu: 0.0.40
codegen_flags: <defaults>
</compile_context>

<pallas_src>
import numpy as np
import jax
import jax.numpy as jnp
from jax.experimental import pallas as pl
from jax.experimental.pallas import tpu as pltpu


def _interp_matrix(out_size: int, in_size: int) -> jnp.ndarray:
    """Row-stochastic 1-D linear interpolation matrix, align_corners=True."""
    A = np.zeros((out_size, in_size), dtype=np.float32)
    for o in range(out_size):
        src = 0.0 if out_size == 1 else o * (in_size - 1) / (out_size - 1)
        i0 = int(np.floor(src))
        i1 = min(i0 + 1, in_size - 1)
        w1 = src - i0
        A[o, i0] += 1.0 - w1
        A[o, i1] += w1
    return jnp.asarray(A)


def _pick_h_tile(H: int) -> int:
    """Largest H tile (<=128, multiple of 8) dividing H; fall back to full H."""
    for t in (128, 64, 32, 16, 8):
        if H % t == 0:
            return t
    return H


def _loss_kernel(xp_ref, ah_ref, awT_ref, lab_ref, num_ref, den_ref, t_ref):
    # xp_ref : (1, C, h, w) f32  low-res logits for this batch element (resident per b)
    # ah_ref : (tH, h)      f32  rows of the H-interpolation matrix for this tile
    # awT_ref: (w, W)       f32  transposed W-interpolation matrix (resident)
    # lab_ref: (1, tH, W)   i32  labels for this tile (-1 = ignore)
    # num_ref, den_ref: (1, 1, 1, 128) f32 per-step partial sums (scalar on all lanes)
    # t_ref  : (C*tH, w)    f32  scratch holding the H-interpolated maps
    C = xp_ref.shape[1]
    tH = ah_ref.shape[0]
    W = awT_ref.shape[1]

    ah = ah_ref[...]          # (tH, h)
    awT = awT_ref[...]        # (w, W)
    xp = xp_ref[0]            # (C, h, w)

    # ---- bilinear resize via matmuls (default precision: bf16 MXU, f32 accumulate) ----
    for c in range(C):        # static unroll; C is small, these dots are tiny
        t_ref[c * tH:(c + 1) * tH, :] = jnp.dot(
            ah, xp[c], preferred_element_type=jnp.float32)          # (tH, w)
    # one batched matmul produces all channels' upsampled logits for this tile
    logits = jnp.dot(t_ref[...], awT,
                     preferred_element_type=jnp.float32)            # (C*tH, W)
    logits = logits.reshape(C, tH, W)                               # channel-major

    # ---- cross entropy with ignore_index = -1 ----
    labels = lab_ref[0]                                             # (tH, W) int32
    mx = jnp.max(logits, axis=0)                                    # (tH, W)
    lse = mx + jnp.log(jnp.sum(jnp.exp(logits - mx[None, :, :]), axis=0))
    cidx = jax.lax.broadcasted_iota(jnp.int32, (C, tH, W), 0)
    picked = jnp.sum(jnp.where(labels[None, :, :] == cidx, logits, 0.0), axis=0)
    valid = (labels != -1).astype(jnp.float32)                      # -1 never matches a channel

    num = jnp.sum((lse - picked) * valid)
    den = jnp.sum(valid)
    num_ref[...] = jnp.full(num_ref.shape, num, dtype=jnp.float32)
    den_ref[...] = jnp.full(den_ref.shape, den, dtype=jnp.float32)


def model_fit_c_semantic(x_pred: jnp.ndarray, x_output: jnp.ndarray) -> jnp.ndarray:
    """Scalar f32 loss: bilinear resize (align_corners=True) + cross entropy (ignore=-1)."""
    B, C, h, w = x_pred.shape
    _, H, W = x_output.shape

    Ah = _interp_matrix(H, h)           # (H, h)
    AwT = _interp_matrix(W, w).T        # (w, W)
    tH = _pick_h_tile(H)
    nH = H // tH

    xp = x_pred.astype(jnp.float32)
    labels = x_output.astype(jnp.int32)

    # Advisory cost estimate for XLA's scheduler (matmuls + softmax elementwise).
    matmul_flops = 2 * B * C * H * w * (h + W)
    elem_flops = 8 * B * C * H * W
    cost = pl.CostEstimate(
        flops=int(matmul_flops + elem_flops),
        transcendentals=int(B * (C + 1) * H * W),
        bytes_accessed=int(xp.size * 4 + labels.size * 4
                           + Ah.size * 4 + AwT.size * 4
                           + 2 * B * nH * 128 * 4),
    )

    num_parts, den_parts = pl.pallas_call(
        _loss_kernel,
        out_shape=(
            jax.ShapeDtypeStruct((B, nH, 1, 128), jnp.float32),
            jax.ShapeDtypeStruct((B, nH, 1, 128), jnp.float32),
        ),
        grid=(B, nH),
        in_specs=[
            pl.BlockSpec((1, C, h, w), lambda b, t: (b, 0, 0, 0)),   # low-res logits, per batch
            pl.BlockSpec((tH, h), lambda b, t: (t, 0)),              # H-interp rows for this tile
            pl.BlockSpec((w, W), lambda b, t: (0, 0)),               # W-interp matrix (resident)
            pl.BlockSpec((1, tH, W), lambda b, t: (b, t, 0)),        # int labels for this tile
        ],
        out_specs=(
            pl.BlockSpec((1, 1, 1, 128), lambda b, t: (b, t, 0, 0)),
            pl.BlockSpec((1, 1, 1, 128), lambda b, t: (b, t, 0, 0)),
        ),
        scratch_shapes=[pltpu.VMEM((C * tH, w), jnp.float32)],
        compiler_params=pltpu.CompilerParams(
            dimension_semantics=("parallel", "parallel"),            # megacore sharding
            vmem_limit_bytes=32 * 1024 * 1024,
        ),
        cost_estimate=cost,
    )(xp, Ah, AwT, labels)

    num = jnp.sum(num_parts[:, :, 0, 0])
    den = jnp.sum(den_parts[:, :, 0, 0])
    # NOTE: if every pixel is ignore_index=-1 this is 0/0 = NaN, matching PyTorch.
    return num / den


def _reference(x_pred, x_output):
    """Pure-JAX reference: F.interpolate(align_corners=True) + F.cross_entropy(ignore_index=-1)."""
    B, C, h, w = x_pred.shape
    _, H, W = x_output.shape
    Ah = _interp_matrix(H, h)
    AwT = _interp_matrix(W, w).T
    t = jnp.einsum('Hh,bchw->bcHw', Ah, x_pred)
    xr = jnp.einsum('bcHw,wW->bcHW', t, AwT)
    logp = jax.nn.log_softmax(xr, axis=1)
    valid = x_output != -1
    lbl = jnp.where(valid, x_output, 0)
    picked = jnp.take_along_axis(logp, lbl[:, None, :, :], axis=1)[:, 0]
    nll = -picked * valid.astype(jnp.float32)
    return jnp.sum(nll) / jnp.sum(valid.astype(jnp.float32))


if __name__ == "__main__":
    key = jax.random.PRNGKey(0)
    k1, k2 = jax.random.split(key)

    B, C, h, w = 2, 4, 8, 8      # low-res prediction logits (segmentation head output)
    H, W = 16, 16                # ground-truth label resolution

    x_pred = jax.random.normal(k1, (B, C, h, w), dtype=jnp.float32)
    # integer labels in [-1, C-1]; -1 pixels are ignored (ignore_index=-1)
    x_output = jax.random.randint(k2, (B, H, W), -1, C, dtype=jnp.int32)

    loss = jax.block_until_ready(model_fit_c_semantic(x_pred, x_output))
    ref = jax.block_until_ready(_reference(x_pred, x_output))

    assert np.isfinite(float(loss))
    assert np.allclose(float(loss), float(ref), rtol=1e-3, atol=2e-3), (float(loss), float(ref))

    print("KERNEL_OK")
</pallas_src>

<mosaic_0001>
module attributes {stable_mosaic.version = 11 : i64} {
  func.func @_loss_kernel(%arg0: i32, %arg1: i32, %arg2: memref<1x4x8x8xf32, #tpu.memory_space<vmem>>, %arg3: memref<16x8xf32, #tpu.memory_space<vmem>>, %arg4: memref<8x16xf32, #tpu.memory_space<vmem>>, %arg5: memref<1x16x16xi32, #tpu.memory_space<vmem>>, %arg6: memref<1x1x1x128xf32, #tpu.memory_space<vmem>>, %arg7: memref<1x1x1x128xf32, #tpu.memory_space<vmem>>, %arg8: memref<64x8xf32, #tpu.memory_space<vmem>>) attributes {dimension_semantics = [#tpu.dimension_semantics<parallel>, #tpu.dimension_semantics<parallel>], iteration_bounds = array<i64: 2, 1>, scalar_prefetch = 0 : i64, scratch_operands = 1 : i64, tpu.core_type = #tpu.core_type<tc>, window_params = [{transform_indices = @transform_0, window_bounds = array<i64: 1, 4, 8, 8>}, {transform_indices = @transform_1, window_bounds = array<i64: 16, 8>}, {pipeline_mode = #tpu.pipeline_mode<synchronous>, transform_indices = @transform_2, window_bounds = array<i64: 8, 16>}, {transform_indices = @transform_3, window_bounds = array<i64: 1, 16, 16>}, {transform_indices = @transform_4, window_bounds = array<i64: 1, 1, 1, 128>}, {transform_indices = @transform_5, window_bounds = array<i64: 1, 1, 1, 128>}]} {
    %c0 = arith.constant 0 : index
    %c0_0 = arith.constant 0 : index
    %0 = vector.load %arg3[%c0, %c0_0] : memref<16x8xf32, #tpu.memory_space<vmem>>, vector<16x8xf32>
    %c0_1 = arith.constant 0 : index
    %c0_2 = arith.constant 0 : index
    %1 = vector.load %arg4[%c0_1, %c0_2] : memref<8x16xf32, #tpu.memory_space<vmem>>, vector<8x16xf32>
    %c0_3 = arith.constant 0 : index
    %c0_4 = arith.constant 0 : index
    %c0_5 = arith.constant 0 : index
    %c0_6 = arith.constant 0 : index
    %2 = vector.load %arg2[%c0_3, %c0_4, %c0_5, %c0_6] : memref<1x4x8x8xf32, #tpu.memory_space<vmem>>, vector<1x4x8x8xf32>
    %3 = vector.shape_cast %2 : vector<1x4x8x8xf32> to vector<4x8x8xf32>
    %4 = vector.extract_strided_slice %3 {offsets = [0, 0, 0], sizes = [1, 8, 8], strides = [1, 1, 1]} : vector<4x8x8xf32> to vector<1x8x8xf32>
    %5 = vector.shape_cast %4 : vector<1x8x8xf32> to vector<8x8xf32>
    %cst = arith.constant dense<0.000000e+00> : vector<16x8xf32>
    %6 = tpu.matmul %0, %5, %cst {dimension_numbers = #tpu.dot_dimension_numbers<[1], [0], [0], [1], [0, 0, 1, 1], [], []>} : vector<16x8xf32>, vector<8x8xf32>, vector<16x8xf32> -> vector<16x8xf32>
    %c0_7 = arith.constant 0 : index
    %c0_8 = arith.constant 0 : index
    %7 = vector.load %arg8[%c0_7, %c0_8] : memref<64x8xf32, #tpu.memory_space<vmem>>, vector<16x8xf32>
    tpu.vector_store %arg8[%c0_7, %c0_8], %6 {strides = array<i32>} : memref<64x8xf32, #tpu.memory_space<vmem>>, vector<16x8xf32>,
    %8 = vector.extract_strided_slice %3 {offsets = [1, 0, 0], sizes = [1, 8, 8], strides = [1, 1, 1]} : vector<4x8x8xf32> to vector<1x8x8xf32>
    %9 = vector.shape_cast %8 : vector<1x8x8xf32> to vector<8x8xf32>
    %cst_9 = arith.constant dense<0.000000e+00> : vector<16x8xf32>
    %10 = tpu.matmul %0, %9, %cst_9 {dimension_numbers = #tpu.dot_dimension_numbers<[1], [0], [0], [1], [0, 0, 1, 1], [], []>} : vector<16x8xf32>, vector<8x8xf32>, vector<16x8xf32> -> vector<16x8xf32>
    %c16 = arith.constant 16 : index
    %c0_10 = arith.constant 0 : index
    %11 = vector.load %arg8[%c16, %c0_10] : memref<64x8xf32, #tpu.memory_space<vmem>>, vector<16x8xf32>
    tpu.vector_store %arg8[%c16, %c0_10], %10 {strides = array<i32>} : memref<64x8xf32, #tpu.memory_space<vmem>>, vector<16x8xf32>,
    %12 = vector.extract_strided_slice %3 {offsets = [2, 0, 0], sizes = [1, 8, 8], strides = [1, 1, 1]} : vector<4x8x8xf32> to vector<1x8x8xf32>
    %13 = vector.shape_cast %12 : vector<1x8x8xf32> to vector<8x8xf32>
    %cst_11 = arith.constant dense<0.000000e+00> : vector<16x8xf32>
    %14 = tpu.matmul %0, %13, %cst_11 {dimension_numbers = #tpu.dot_dimension_numbers<[1], [0], [0], [1], [0, 0, 1, 1], [], []>} : vector<16x8xf32>, vector<8x8xf32>, vector<16x8xf32> -> vector<16x8xf32>
    %c32 = arith.constant 32 : index
    %c0_12 = arith.constant 0 : index
    %15 = vector.load %arg8[%c32, %c0_12] : memref<64x8xf32, #tpu.memory_space<vmem>>, vector<16x8xf32>
    tpu.vector_store %arg8[%c32, %c0_12], %14 {strides = array<i32>} : memref<64x8xf32, #tpu.memory_space<vmem>>, vector<16x8xf32>,
    %16 = vector.extract_strided_slice %3 {offsets = [3, 0, 0], sizes = [1, 8, 8], strides = [1, 1, 1]} : vector<4x8x8xf32> to vector<1x8x8xf32>
    %17 = vector.shape_cast %16 : vector<1x8x8xf32> to vector<8x8xf32>
    %cst_13 = arith.constant dense<0.000000e+00> : vector<16x8xf32>
    %18 = tpu.matmul %0, %17, %cst_13 {dimension_numbers = #tpu.dot_dimension_numbers<[1], [0], [0], [1], [0, 0, 1, 1], [], []>} : vector<16x8xf32>, vector<8x8xf32>, vector<16x8xf32> -> vector<16x8xf32>
    %c48 = arith.constant 48 : index
    %c0_14 = arith.constant 0 : index
    %19 = vector.load %arg8[%c48, %c0_14] : memref<64x8xf32, #tpu.memory_space<vmem>>, vector<16x8xf32>
    tpu.vector_store %arg8[%c48, %c0_14], %18 {strides = array<i32>} : memref<64x8xf32, #tpu.memory_space<vmem>>, vector<16x8xf32>,
    %c0_15 = arith.constant 0 : index
    %c0_16 = arith.constant 0 : index
    %20 = vector.load %arg8[%c0_15, %c0_16] : memref<64x8xf32, #tpu.memory_space<vmem>>, vector<64x8xf32>
    %cst_17 = arith.constant dense<0.000000e+00> : vector<64x16xf32>
    %21 = tpu.matmul %20, %1, %cst_17 {dimension_numbers = #tpu.dot_dimension_numbers<[1], [0], [0], [1], [0, 0, 1, 1], [], []>} : vector<64x8xf32>, vector<8x16xf32>, vector<64x16xf32> -> vector<64x16xf32>
    %22 = vector.shape_cast %21 : vector<64x16xf32> to vector<4x16x16xf32>
    %c0_18 = arith.constant 0 : index
    %c0_19 = arith.constant 0 : index
    %c0_20 = arith.constant 0 : index
    %23 = vector.load %arg5[%c0_18, %c0_19, %c0_20] : memref<1x16x16xi32, #tpu.memory_space<vmem>>, vector<1x16x16xi32>
    %24 = vector.shape_cast %23 : vector<1x16x16xi32> to vector<16x16xi32>
    %cst_21 = arith.constant dense<0xFF800000> : vector<16x16xf32>
    %25 = vector.multi_reduction <maximumf>, %22, %cst_21 [0] : vector<4x16x16xf32> to vector<16x16xf32>
    %26 = vector.shape_cast %25 : vector<16x16xf32> to vector<1x16x16xf32>
    %27 = vector.broadcast %26 : vector<1x16x16xf32> to vector<4x16x16xf32>
    %28 = arith.subf %22, %27 : vector<4x16x16xf32>
    %29 = math.exp %28 : vector<4x16x16xf32>
    %cst_22 = arith.constant dense<0.000000e+00> : vector<16x16xf32>
    %30 = vector.multi_reduction <add>, %29, %cst_22 [0] : vector<4x16x16xf32> to vector<16x16xf32>
    %31 = math.log %30 : vector<16x16xf32>
    %32 = arith.addf %25, %31 : vector<16x16xf32>
    %33 = tpu.iota {dimensions = array<i32: 0>} : vector<4x16x16xi32>
    %34 = vector.shape_cast %24 : vector<16x16xi32> to vector<1x16x16xi32>
    %35 = vector.broadcast %34 : vector<1x16x16xi32> to vector<4x16x16xi32>
    %36 = arith.cmpi eq, %35, %33 : vector<4x16x16xi32>
    %cst_23 = arith.constant 0.000000e+00 : f32
    %37 = vector.broadcast %cst_23 : f32 to vector<4x16x16xf32>
    %38 = arith.select %36, %22, %37 : vector<4x16x16xi1>, vector<4x16x16xf32>
    %cst_24 = arith.constant dense<0.000000e+00> : vector<16x16xf32>
    %39 = vector.multi_reduction <add>, %38, %cst_24 [0] : vector<4x16x16xf32> to vector<16x16xf32>
    %c-1_i32 = arith.constant -1 : i32
    %40 = vector.broadcast %c-1_i32 : i32 to vector<16x16xi32>
    %41 = arith.cmpi ne, %24, %40 : vector<16x16xi32>
    %42 = arith.extui %41 : vector<16x16xi1> to vector<16x16xi32>
    %43 = arith.sitofp %42 : vector<16x16xi32> to vector<16x16xf32>
    %44 = arith.subf %32, %39 : vector<16x16xf32>
    %45 = arith.mulf %44, %43 : vector<16x16xf32>
    %46 = vector.shape_cast %45 : vector<16x16xf32> to vector<1x16x16xf32>
    %cst_25 = arith.constant dense<0.000000e+00> : vector<1xf32>
    %47 = vector.multi_reduction <add>, %46, %cst_25 [1, 2] : vector<1x16x16xf32> to vector<1xf32>
    %48 = vector.shape_cast %47 : vector<1xf32> to vector<1x1x1xf32>
    %49 = vector.extract %48[0, 0, 0] : f32 from vector<1x1x1xf32>
    %50 = vector.shape_cast %43 : vector<16x16xf32> to vector<1x16x16xf32>
    %cst_26 = arith.constant dense<0.000000e+00> : vector<1xf32>
    %51 = vector.multi_reduction <add>, %50, %cst_26 [1, 2] : vector<1x16x16xf32> to vector<1xf32>
    %52 = vector.shape_cast %51 : vector<1xf32> to vector<1x1x1xf32>
    %53 = vector.extract %52[0, 0, 0] : f32 from vector<1x1x1xf32>
    %54 = vector.broadcast %49 : f32 to vector<1x1x1x128xf32>
    %c0_27 = arith.constant 0 : index
    %c0_28 = arith.constant 0 : index
    %c0_29 = arith.constant 0 : index
    %c0_30 = arith.constant 0 : index
    %55 = vector.load %arg6[%c0_27, %c0_28, %c0_29, %c0_30] : memref<1x1x1x128xf32, #tpu.memory_space<vmem>>, vector<1x1x1x128xf32>
    tpu.vector_store %arg6[%c0_27, %c0_28, %c0_29, %c0_30], %54 {strides = array<i32>} : memref<1x1x1x128xf32, #tpu.memory_space<vmem>>, vector<1x1x1x128xf32>,
    %56 = vector.broadcast %53 : f32 to vector<1x1x1x128xf32>
    %c0_31 = arith.constant 0 : index
    %c0_32 = arith.constant 0 : index
    %c0_33 = arith.constant 0 : index
    %c0_34 = arith.constant 0 : index
    %57 = vector.load %arg7[%c0_31, %c0_32, %c0_33, %c0_34] : memref<1x1x1x128xf32, #tpu.memory_space<vmem>>, vector<1x1x1x128xf32>
    tpu.vector_store %arg7[%c0_31, %c0_32, %c0_33, %c0_34], %56 {strides = array<i32>} : memref<1x1x1x128xf32, #tpu.memory_space<vmem>>, vector<1x1x1x128xf32>,
    return
  }
  func.func @transform_0(%arg0: i32, %arg1: i32) -> (i32, i32, i32, i32) {
    %c0_i32 = arith.constant 0 : i32
    %c0_i32_0 = arith.constant 0 : i32
    %c0_i32_1 = arith.constant 0 : i32
    %c0_i32_2 = arith.constant 0 : i32
    return %arg0, %c0_i32, %c0_i32_0, %c0_i32_1 : i32, i32, i32, i32
  }
  func.func @transform_1(%arg0: i32, %arg1: i32) -> (i32, i32) {
    %c0_i32 = arith.constant 0 : i32
    %c0_i32_0 = arith.constant 0 : i32
    return %arg1, %c0_i32 : i32, i32
  }
  func.func @transform_2(%arg0: i32, %arg1: i32) -> (i32, i32) {
    %c0_i32 = arith.constant 0 : i32
    %c0_i32_0 = arith.constant 0 : i32
    %c0_i32_1 = arith.constant 0 : i32
    return %c0_i32, %c0_i32_0 : i32, i32
  }
  func.func @transform_3(%arg0: i32, %arg1: i32) -> (i32, i32, i32) {
    %c0_i32 = arith.constant 0 : i32
    %c0_i32_0 = arith.constant 0 : i32
    return %arg0, %arg1, %c0_i32 : i32, i32, i32
  }
  func.func @transform_4(%arg0: i32, %arg1: i32) -> (i32, i32, i32, i32) {
    %c0_i32 = arith.constant 0 : i32
    %c0_i32_0 = arith.constant 0 : i32
    %c0_i32_1 = arith.constant 0 : i32
    return %arg0, %arg1, %c0_i32, %c0_i32_0 : i32, i32, i32, i32
  }
  func.func @transform_5(%arg0: i32, %arg1: i32) -> (i32, i32, i32, i32) {
    %c0_i32 = arith.constant 0 : i32
    %c0_i32_0 = arith.constant 0 : i32
    %c0_i32_1 = arith.constant 0 : i32
    return %arg0, %arg1, %c0_i32, %c0_i32_0 : i32, i32, i32, i32
  }
}

</mosaic_0001>

<bundles_post_ra>
// kernel: tpu_custom_call.1
= control target key start
LH: loop header
LB: loop body
LE: loop exit
PB: predicated region body
PF: predicated region fallthrough
CT: control target
= control target key end

     0   :  { %s1828_s0 = inlined_call_operand.hbm [shape: f32[2,4,8,8], index: 0, kind: input, shape index: {}]   ;;  %s1829_s1 = inlined_call_operand.vmem [shape: f32[16,8], index: 1, kind: input, shape index: {}]   ;;  %s1830_s2 = inlined_call_operand.vmem [shape: f32[8,16], index: 2, kind: input, shape index: {}]   ;;  %s1831_s3 = inlined_call_operand.hbm [shape: s32[2,16,16], index: 3, kind: input, shape index: {}]   ;;  %s1832_s4 = inlined_call_operand.hbm [shape: f32[2,1,1,128], index: 4, kind: output, shape index: {0}]   ;;  %s1833_s5 = inlined_call_operand.hbm [shape: f32[2,1,1,128], index: 5, kind: output, shape index: {1}]  }
   0x1   :  { %1835 = sst [smem:[#allocation17_spill]] %s1828_s0 }
   0x2   :  { %11 = vsyncpa [#allocation4], 0 }
   0x3   :  { %13 = vsyncpa [#allocation4 + $0x1], 0 }
   0x4   :  { %14 = vsyncpa [#allocation7], 0 }
   0x5   :  { %16 = vsyncpa [#allocation7 + $0x1], 0 }
   0x6   :  { %17 = vsyncpa [#allocation5], 0 }
   0x7   :  { %19 = vsyncpa [#allocation5 + $0x1], 0 }
   0x8   :  { %20 = vsyncpa [#allocation10], 0 }
   0x9   :  { %22 = vsyncpa [#allocation10 + $0x1], 0  ;;  %s1503_s18 = smov 0   ;;  %s1505_s19 = smov 0  }
   0xa   :  { %s1507_s20 = smov 0   ;;  %s1509_s21 = smov 0  }
   0xb   :  { %s1511_s22 = smov 0   ;;  %s1513_s23 = smov 0  }
   0xc LB: > { %s1100_s24 = sadd.s32 4294967295, %s1464_s23   ;;  %s1101_s25 = sadd.s32 4294967294, %s1464_s23   ;;  %s1464_s23 = sphi %s1513_s23, %s28_s23   ;;  %s1460_s22 = sphi %s1511_s22, %s1852_s22   ;;  %s1456_s21 = sphi %s1509_s21, %s1851_s21   ;;  %s1452_s20 = sphi %s1507_s20, %s1850_s20   ;;  %s1448_s19 = sphi %s1505_s19, %s1849_s19   ;;  %s1444_s18 = sphi %s1503_s18, %s1848_s18  }
   0xd   : > { %s40_s26 = sadd.s32 1, %s1460_s22  ;;  %s47_s27 = sadd.s32 1, %s1452_s20 }
   0xe   : > { %p42_p0 = scmp.ge.s32.totalorder %s40_s26, 2  ;;  %p54_p1 = scmp.ne.s32.totalorder %s1452_s20, %s1448_s19 }
   0xf   : > { %p55_p2 = scmp.eq.s32.totalorder %s1464_s23, 0  ;;  %p60_p3 = scmp.ne.s32.totalorder %s1448_s19, %s1444_s18 }
  0x10   : > { %s1854_s26 = smov (%p42_p0, %s40_s26), 0  ;;  %p61_p5 = scmp.eq.s32.totalorder %s1100_s24, 0 }
  0x11   : > { %1836 = sst [smem:[#allocation15_spill]] %s1854_s26  ;;  %p1544_p4 = por %p55_p2, %p54_p1 }
  0x12   : > { %s44_s29 = ssub.s32 %s1460_s22, %s1854_s26  ;;  %p161_p6 = scmp.eq.s32.totalorder %s1100_s24, 1 }
  0x13   : > { %p45_p7 = scmp.eq.s32.totalorder %s44_s29, 0  ;;  %p1550_p8 = por %p61_p5, %p60_p3 }
  0x14   : > { %p1554_p9 = por %p161_p6, %p54_p1  ;;  %p167_p10 = scmp.eq.s32.totalorder %s1101_s25, 1 }
  0x15   : > { %s1559_s7 = scalar_select %p45_p7, %s1452_s20, %s47_s27  }
  0x16   : > { %p1561_p11 = por %p167_p10, %p60_p3  ;;  %p1221_p13 = scmp.lt.s32.totalorder %s1464_s23, 2 }
  0x17   : > { %1840 = sst [smem:[#allocation16_spill]] %s1559_s7  ;;  %s1568_s9 = sand.u32 1, %s1452_s20  }
  0x18   : > { %s1105_s10 = sshll.u32 %s1568_s9, 5  ;;  %s1136_s11 = sshll.u32 %s1460_s22, 9 }
  0x19   : > { %s1842_s0 = sld [smem:[#allocation17_spill]]  ;;  %s231_s15 = scalar_lea.vmem [#allocation3], %s1105_s10 }
  0x1a   : > { %s238_s16 = sshll.u32 %s231_s15, 4  ;;  %p1577_p0 = pnand %p1221_p13, %p1544_p4  ;;  %s239_s16 = int_to_ptr.vmem [resolvable:$true] %s238_s16 }
  0x1b   : > { %p1111_p1 = scmp.ge.s32.totalorder %s1464_s23, 1  ;;  %s228_s24 = scalar_lea.sflag [#allocation4], %s1568_s9 }
  0x1c   : > { %p1296_p2 = pneg %p1577_p0  ;;  %s1307_s25 = scalar_lea.vmem %s239_s16, 512 }
  0x1d   : > { %p1308_p3 = scmp.ne.s32.totalorder %s239_s16, %s1307_s25  ;;  %s1466_s27 = smov [#allocation3]  }
  0x1e   : > { %s1312_s29 = sshll.u32 %s1466_s27, 4  ;;  %s1313_s29 = int_to_ptr.vmem [resolvable:$false] %s1312_s29 }
  0x1f   : > { %s237_s14 = scalar_lea.hbm %s1842_s0, %s1136_s11  ;;  %p1310_p5 = pnand %p1308_p3, %p1296_p2 }
  0x20   : > { %s1314_s28 = scalar_lea.vmem %s1313_s29, 1024  ;;  %p1315_p4 = scmp.lt.s32.totalorder %s239_s16, %s1313_s29 }
  0x21   : > { %p1311_p6 = pneg %p1310_p5  ;;  %p1316_p7 = scmp.lt.s32.totalorder %s1314_s28, %s1307_s25 }
  0x23   : > { %p1317_p10 = por %p1316_p7, %p1315_p4 }
  0x25   : > { %p1318_p13 = pnand %p1317_p10, %p1311_p6 }
  0x27   : > { %1321 = shalt.err (!%p1318_p13)
}
  0x28   : > { %s1467_s10 = smov 128   ;;  %s1468_s11 = smov 8  }
  0x29   : > { %1210 = dma.hbm_to_vmem [thread:$0]  (!%p1577_p0), %s237_s14, 512, %s239_s16, %s228_s24, %s1467_s10, %s1467_s10, %s1468_s11  }
  0x2a   : > { %p269_p3 = scmp.lt.s32.totalorder %s1464_s23, 3  ;;  %s1108_s12 = sshll.u32 %s1568_s9, 4 }
  0x2b   : > { %s1137_s13 = sshll.u32 %s1460_s22, 8  ;;  %s252_s28 = scalar_lea.vmem [#allocation6], %s1108_s12 }
  0x2c   : > { %p1595_p5 = pnand %p1111_p1, %p269_p3  ;;  %s260_s29 = scalar_lea.hbm %s1831_s3, %s1137_s13 }
  0x2d   : > { %s261_s0 = sshll.u32 %s252_s28, 4  ;;  %s249_s26 = scalar_lea.sflag [#allocation7], %s1568_s9  ;;  %s262_s0 = int_to_ptr.vmem [resolvable:$true] %s261_s0 }
  0x2e   : > { %s1335_s7 = scalar_lea.vmem %s262_s0, 256  ;;  %s1469_s14 = smov [#allocation6]  }
  0x2f   : > { %p1336_p6 = scmp.ne.s32.totalorder %s262_s0, %s1335_s7  ;;  %s1340_s16 = sshll.u32 %s1469_s14, 4  ;;  %s1341_s16 = int_to_ptr.vmem [resolvable:$false] %s1340_s16 }
  0x30   : > { %s1342_s24 = scalar_lea.vmem %s1341_s16, 512  ;;  %p1343_p1 = scmp.lt.s32.totalorder %s262_s0, %s1341_s16 }
  0x31   : > { %p1338_p4 = pnand %p1336_p6, %p1296_p2  ;;  %p1344_p10 = scmp.lt.s32.totalorder %s1342_s24, %s1335_s7 }
  0x33   : > { %p1339_p7 = pneg %p1338_p4  ;;  %p1345_p13 = por %p1344_p10, %p1343_p1 }
  0x35   : > { %p1346_p3 = pnand %p1345_p13, %p1339_p7 }
  0x37   : > { %1349 = shalt.err (!%p1346_p3)
}
  0x38   : > { %1213 = dma.hbm_to_vmem [thread:$0]  (!%p1577_p0), %s260_s29, 256, %s262_s0, %s249_s26, %s1467_s10, %s1467_s10, %s1468_s11  }
  0x39   : > { %273 = sbr.rel (%p1595_p5) target bundleno = 771 (0x303), region = 36  ;;  %s1611_s9 = sand.u32 (!%p1595_p5), 1, %s1448_s19  }
  0x3a   : > { %s1112_s12 = sshll.u32 (!%p1595_p5), %s1611_s9, 5  ;;  %s276_s13 = scalar_lea.sflag (!%p1595_p5), [#allocation4], %s1611_s9 }
  0x3b   : > { %s279_s25 = scalar_lea.vmem (!%p1595_p5), [#allocation3], %s1112_s12 }
  0x3e   : > { %1427 = dma.done.wait (%p1550_p8), %s276_s13, 512  }
  0x3f   : > { %1429 = vsyncadd (%p1550_p8), %s276_s13, 4294966784  ;;  %s1113_s0 = sshll.u32 %s1611_s9, 4  ;;  %s285_s26 = scalar_lea.sflag [#allocation7], %s1611_s9 }
  0x40   : > { %s1621_s7 = scalar_lea.vmem [#allocation6], %s1113_s0 }
  0x41   : > { %1431 = dma.done.wait (%p1550_p8), %s285_s26, 256  }
  0x42   : > { %1433 = vsyncadd (%p1550_p8), %s285_s26, 4294967040  ;;  %vm342_vm0 = vcmask 64512   ;;  %v338_v0 = vld [vmem:[%s279_s25] sm:$0xff]  ;;  %v336_v2 = vld [vmem:[%s1829_s1 + $0x8] sm:$0xff]  ;;  %vm796_vm1 = vcmask 130048   ;;  %s1132_s29 = sshll.u32 %s1456_s21, 4 }
  0x43   : > { %v335_v1 = vld [vmem:[%s1829_s1] sm:$0xff]  ;;  %1159 = vmatprep.subr.mxu0 %v338_v0  ;;  %v340_v3 = vld [vmem:[%s279_s25 + $0x10] sm:$0xff]  ;;  %v339_v4 = vld [vmem:[%s279_s25 + $0x8] sm:$0xff]  ;;  %s321_s28 = scalar_lea.vmem [#allocation8], %s1611_s9  ;;  %s327_s16 = scalar_lea.vmem [#allocation9], %s1611_s9 }
  0x44   : > { %1161 = vmatprep.mubr.msk.f32.mxu0 %vm342_vm0, %v335_v1  ;;  %1160 = vmatpush3.msra.mxu0 %v338_v0  ;;  %v341_v5 = vld [vmem:[%s279_s25 + $0x18] sm:$0xff]  ;;  %v337_v6 = vld [vmem:[%s1830_s2] sm:$0xff]  ;;  %s941_s14 = sshll.u32 %s321_s28, 4  ;;  %s955_s24 = sshll.u32 %s327_s16, 4  ;;  %s1756_s14 = int_to_ptr.vmem [resolvable:$true] %s941_s14  ;;  %s1758_s24 = int_to_ptr.vmem [resolvable:$true] %s955_s24 }
  0x45   : > { %1164 = vmatprep.subr.mxu1 %v339_v4  ;;  %1162 = vmatmul.mubr.msk.f32.vlgmr.msra.gmra.mxu0 %vm342_vm0, %v336_v2  ;;  %s1754_s25 = scalar_lea.hbm %s1832_s4, %s1132_s29  ;;  %s924_s26 = scalar_lea.sflag [#allocation5], %s1611_s9 }
  0x46   : > { %1169 = vmatprep.subr.mxu0 %v340_v3  ;;  %1165 = vmatpush3.msra.mxu1 %v339_v4  ;;  %s1471_s17 = smov [#allocation8]  }
  0x47   : > { %1170 = vmatpush3.msra.mxu0 %v340_v3  ;;  %1166 = vmatprep.mubr.msk.f32.mxu1 %vm342_vm0, %v335_v1  ;;  %s1354_s10 = sshll.u32 %s1471_s17, 4  ;;  %s1355_s10 = int_to_ptr.vmem [resolvable:$false] %s1354_s10 }
  0x48   : > { %1171 = vmatprep.mubr.msk.f32.mxu0 %vm342_vm0, %v335_v1  ;;  %1167 = vmatmul.mubr.msk.f32.vlgmr.msra.gmra.mxu1 %vm342_vm0, %v336_v2  ;;  %s1356_s11 = scalar_lea.vmem %s1355_s10, 32  ;;  %p1357_p5 = scmp.lt.s32.totalorder %s1756_s14, %s1355_s10 }
  0x49   : > { %1174 = vmatprep.subr.mxu1 %v341_v5  ;;  %1172 = vmatmul.mubr.msk.f32.vlgmr.msra.gmra.mxu0 %vm342_vm0, %v336_v2 }
  0x4a   : > { %1175 = vmatpush3.msra.mxu1 %v341_v5  ;;  %1176 = vmatprep.mubr.msk.f32.mxu1 %vm342_vm0, %v335_v1 }
  0x4b   : > { %1179 = vmatprep.subr.mxu0 %v337_v6  ;;  %1193 = vmatprep.subr.mxu1 %v337_v6 }
  0x4c   : > { %1177 = vmatmul.mubr.msk.f32.vlgmr.msra.gmra.mxu1 %vm342_vm0, %v336_v2  ;;  %1180 = vmatpush3.msra.mxu0 %v337_v6 }
  0x4d   : > { %1194 = vmatpush3.msra.mxu1 %v337_v6 }
 0x105   : > { %v1163_v7 = vpop.f32.mrf.mxu0 }
 0x106   : > { %425 = vst.msk [vmem:[#allocation2 + $0x8] sm:$0xff] %vm342_vm0, %v1163_v7 }
 0x107   : > { %v415_v8 = vpop.f32.mrf.mxu0 }
 0x108   : > { %424 = vst.msk [vmem:[#allocation2] sm:$0xff] %vm342_vm0, %v415_v8  ;;  %v1168_v9 = vpop.f32.mrf.mxu1 }
 0x109   : > { %502 = vst.msk [vmem:[#allocation2 + $0x18] sm:$0xff] %vm342_vm0, %v1168_v9  ;;  %v1173_v10 = vpop.f32.mrf.mxu0 }
 0x10a   : > { %579 = vst.msk [vmem:[#allocation2 + $0x28] sm:$0xff] %vm342_vm0, %v1173_v10  ;;  %v492_v11 = vpop.f32.mrf.mxu1 }
 0x10b   : > { %501 = vst.msk [vmem:[#allocation2 + $0x10] sm:$0xff] %vm342_vm0, %v492_v11  ;;  %v569_v12 = vpop.f32.mrf.mxu0 }
 0x10c   : > { %578 = vst.msk [vmem:[#allocation2 + $0x20] sm:$0xff] %vm342_vm0, %v569_v12  ;;  %v1178_v13 = vpop.f32.mrf.mxu1 }
 0x10d   : > { %656 = vst.msk [vmem:[#allocation2 + $0x38] sm:$0xff] %vm342_vm0, %v1178_v13  ;;  %v658_v16 = vld [vmem:[#allocation2 + $0x8] sm:$0xff] }
 0x10e   : > { %v646_v14 = vpop.f32.mrf.mxu1  ;;  %v795_v13 = vld [vmem:[%s1621_s7 + $0x8] sm:$0xff] }
 0x10f   : > { %655 = vst.msk [vmem:[#allocation2 + $0x30] sm:$0xff] %vm342_vm0, %v646_v14  ;;  %v657_v15 = vld [vmem:[#allocation2] sm:$0xff]  ;;  %vm858_vm2 = vcmp.eq.s32.totalorder %v795_v13, 1  ;;  %vm856_vm3 = vcmp.eq.s32.totalorder %v795_v13, 0  ;;  %vm860_vm6 = vcmp.eq.s32.totalorder %v795_v13, 2  ;;  %vm862_vm7 = vcmp.eq.s32.totalorder %v795_v13, 3 }
 0x110   : > { %1181 = vmatprep.mubr.msk.f32.mxu0 %vm342_vm0, %v657_v15  ;;  %v660_v19 = vld [vmem:[#allocation2 + $0x18] sm:$0xff]  ;;  %vm886_vm10 = vcmp.ne.s32.totalorder %v795_v13, 4294967295 }
 0x111   : > { %1182 = vmatmul.mubr.msk.f32.vlgmr.msra.gmra.mxu0 %vm342_vm0, %v658_v16  ;;  %v662_v20 = vld [vmem:[#allocation2 + $0x28] sm:$0xff] }
 0x112   : > { %v659_v17 = vld [vmem:[#allocation2 + $0x10] sm:$0xff] }
 0x113   : > { %1184 = vmatprep.mubr.msk.f32.mxu0 %vm342_vm0, %v659_v17  ;;  %v661_v18 = vld [vmem:[#allocation2 + $0x20] sm:$0xff] }
 0x114   : > { %1187 = vmatprep.mubr.msk.f32.mxu1 %vm342_vm0, %v661_v18  ;;  %v664_v22 = vld [vmem:[#allocation2 + $0x38] sm:$0xff] }
 0x115   : > { %1185 = vmatmul.mubr.msk.f32.gmra.mxu0 %vm342_vm0, %v660_v19  ;;  %1188 = vmatmul.mubr.msk.f32.vlgmr.msra.gmra.mxu1 %vm342_vm0, %v662_v20  ;;  %v794_v19 = vld [vmem:[%s1621_s7] sm:$0xff]  ;;  %s1350_s7 = scalar_lea.vmem %s1756_s14, 16 }
 0x116   : > { %v663_v21 = vld [vmem:[#allocation2 + $0x30] sm:$0xff]  ;;  %vm857_vm4 = vcmp.eq.s32.totalorder %v794_v19, 1  ;;  %vm855_vm5 = vcmp.eq.s32.totalorder %v794_v19, 0  ;;  %vm859_vm8 = vcmp.eq.s32.totalorder %v794_v19, 2  ;;  %vm861_vm9 = vcmp.eq.s32.totalorder %v794_v19, 3  ;;  %p1351_p8 = scmp.ne.s32.totalorder %s1756_s14, %s1350_s7  ;;  %p1358_p6 = scmp.lt.s32.totalorder %s1356_s11, %s1350_s7 }
 0x117   : > { %1190 = vmatprep.mubr.msk.f32.mxu1 %vm342_vm0, %v663_v21  ;;  %vm885_vm11 = vcmp.ne.s32.totalorder %v794_v19, 4294967295 }
 0x118   : > { %p1352_p0 = pnand %p1351_p8, %p1554_p9  ;;  %p1359_p4 = por %p1358_p6, %p1357_p5 }
 0x119   : > { %1191 = vmatmul.mubr.msk.f32.gmra.mxu1 %vm342_vm0, %v664_v22 }
 0x11a   : > { %p1353_p2 = pneg %p1352_p0 }
 0x11c   : > { %p1360_p7 = pnand %p1359_p4, %p1353_p2 }
 0x1d1   : > { %v1660_v23 = vpop.f32.mrf.mxu0 }
 0x1d2   : > { %v804_v31 = vsel %vm796_vm1, %v1660_v23, -inf  ;;  %v864_v22 = vsel %vm856_vm3, %v1660_v23, 0.0 }
 0x1d3   : > { %v1662_v24 = vpop.f32.mrf.mxu0 }
 0x1d4   : > { %v797_v40 = vsel %vm796_vm1, %v1662_v24, -inf }
 0x1d5   : > { %v1664_v25 = vpop.f32.mrf.mxu0  ;;  %v1666_v26 = vpop.f32.mrf.mxu1 }
 0x1d6   : > { %v806_v28 = vsel %vm796_vm1, %v1666_v26, -inf  ;;  %v805_v32 = vsel %vm796_vm1, %v1664_v25, -inf  ;;  %v866_v20 = vsel %vm858_vm2, %v1664_v25, 0.0 }
 0x1d7   : > { %v1668_v27 = vpop.f32.mrf.mxu1  ;;  %v1672_v29 = vpop.f32.mrf.mxu0  ;;  %v807_v34 = vmax.f32 %v804_v31, %v806_v28  ;;  %v879_v28 = vsel %vm796_vm1, %v866_v20, 0.0 }
 0x1d8   : > { %v799_v35 = vsel %vm796_vm1, %v1668_v27, -inf  ;;  %v798_v38 = vsel %vm796_vm1, %v1672_v29, -inf  ;;  %v865_v31 = vsel %vm857_vm4, %v1672_v29, 0.0 }
 0x1d9   : > { %v1674_v30 = vpop.f32.mrf.mxu1  ;;  %v800_v43 = vmax.f32 %v797_v40, %v799_v35  ;;  %v868_v35 = vsel %vm860_vm6, %v1666_v26, 0.0  ;;  %v867_v40 = vsel %vm859_vm8, %v1668_v27, 0.0 }
 0x1da   : > { %v808_v33 = vsel %vm796_vm1, %v1674_v30, -inf }
 0x1db   : > { %v809_v36 = vmax.f32 %v805_v32, %v808_v33  ;;  %v1684_v37 = vpop.f32.mrf.mxu1  ;;  %v878_v32 = vsel %vm796_vm1, %v864_v22, 0.0  ;;  %v863_v33 = vsel %vm855_vm5, %v1662_v24, 0.0 }
 0x1dc   : > { %v801_v39 = vsel %vm796_vm1, %v1684_v37, -inf }
 0x1dd   : > { %v1692_v41 = vmax.f32 %v807_v34, %v809_v36  ;;  %v802_v42 = vmax.f32 %v798_v38, %v801_v39  ;;  %v880_v34 = vadd.f32 %v879_v28, %v878_v32  ;;  %v871_v36 = vsel %vm796_vm1, %v863_v33, 0.0 }
 0x1de   : > { %v881_v38 = vsel %vm796_vm1, %v868_v35, 0.0 }
 0x1df   : > { %v812_v44 = vsub.f32 %v1660_v23, %v1692_v41  ;;  %v814_v45 = vsub.f32 %v1664_v25, %v1692_v41  ;;  %v816_v46 = vsub.f32 %v1666_v26, %v1692_v41  ;;  %v818_v47 = vsub.f32 %v1674_v30, %v1692_v41 }
 0x1e0   : > { %v1702_v48 = vmax.f32 %v800_v43, %v802_v42  ;;  %v872_v25 = vsel %vm796_vm1, %v865_v31, 0.0  ;;  %v870_v23 = vsel %vm862_vm7, %v1674_v30, 0.0  ;;  %v882_v39 = vadd.f32 %v881_v38, %v880_v34 }
 0x1e1   : > { %v821_v49 = vmul.f32 1.442695, %v812_v44  ;;  %v825_v50 = vmul.f32 1.442695, %v814_v45  ;;  %v829_v51 = vmul.f32 1.442695, %v816_v46 }
 0x1e2   : > { %v833_v52 = vmul.f32 1.442695, %v818_v47  ;;  %v811_v53 = vsub.f32 %v1662_v24, %v1702_v48  ;;  %v813_v54 = vsub.f32 %v1672_v29, %v1702_v48  ;;  %v815_v55 = vsub.f32 %v1668_v27, %v1702_v48 }
 0x1e3   : > { %1274 = vpow2.f32 %v821_v49  ;;  %v817_v56 = vsub.f32 %v1684_v37, %v1702_v48  ;;  %v873_v29 = vadd.f32 %v872_v25, %v871_v36  ;;  %v883_v24 = vsel %vm796_vm1, %v870_v23, 0.0 }
 0x1e4   : > { %1276 = vpow2.f32 %v825_v50  ;;  %v819_v57 = vmul.f32 1.442695, %v811_v53  ;;  %v823_v58 = vmul.f32 1.442695, %v813_v54  ;;  %v827_v59 = vmul.f32 1.442695, %v815_v55 }
 0x1e5   : > { %1278 = vpow2.f32 %v829_v51  ;;  %v831_v60 = vmul.f32 1.442695, %v817_v56  ;;  %v869_v43 = vsel %vm861_vm9, %v1684_v37, 0.0  ;;  %v874_v44 = vsel %vm796_vm1, %v867_v40, 0.0 }
 0x1e6   : > { %1280 = vpow2.f32 %v833_v52  ;;  %v875_v45 = vadd.f32 %v874_v44, %v873_v29  ;;  %v884_v30 = vadd.f32 %v883_v24, %v882_v39  ;;  %v876_v49 = vsel %vm796_vm1, %v869_v43, 0.0 }
 0x1e7   : > { %1282 = vpow2.f32 %v819_v57  ;;  %v1470_v27 = vmov 0.0  }
 0x1e8   : > { %1284 = vpow2.f32 %v823_v58  ;;  %v1131_v52 = vsel %vm886_vm10, 1.0, %v1470_v27  ;;  %v877_v53 = vadd.f32 %v876_v49, %v875_v45  ;;  %v1130_v37 = vsel %vm885_vm11, 1.0, %v1470_v27 }
 0x1e9   : > { %1286 = vpow2.f32 %v827_v59 }
 0x1ea   : > { %1288 = vpow2.f32 %v831_v60  ;;  %v908_v60 = vsel %vm796_vm1, %v1131_v52, 0.0 }
 0x1f0   : > { %v1275_v61 = vpop.eup %1274 }
 0x1f1   : > { %v1277_v62 = vpop.eup %1276  ;;  %v842_v63 = vsel %vm796_vm1, %v1275_v61, 0.0 }
 0x1f2   : > { %v1279_v0 = vpop.eup %1278  ;;  %v843_v1 = vsel %vm796_vm1, %v1277_v62, 0.0 }
 0x1f3   : > { %v1281_v2 = vpop.eup %1280  ;;  %v844_v3 = vadd.f32 %v843_v1, %v842_v63  ;;  %v845_v5 = vsel %vm796_vm1, %v1279_v0, 0.0 }
 0x1f4   : > { %v1283_v4 = vpop.eup %1282  ;;  %v847_v11 = vsel %vm796_vm1, %v1281_v2, 0.0 }
 0x1f5   : > { %v1285_v6 = vpop.eup %1284  ;;  %v835_v7 = vsel %vm796_vm1, %v1283_v4, 0.0  ;;  %v846_v8 = vadd.f32 %v845_v5, %v844_v3 }
 0x1f6   : > { %v1287_v9 = vpop.eup %1286  ;;  %v836_v10 = vsel %vm796_vm1, %v1285_v6, 0.0 }
 0x1f7   : > { %v1289_v12 = vpop.eup %1288  ;;  %v837_v14 = vadd.f32 %v836_v10, %v835_v7  ;;  %v848_v15 = vadd.f32 %v847_v11, %v846_v8  ;;  %v838_v16 = vsel %vm796_vm1, %v1287_v9, 0.0 }
 0x1f8   : > { %v840_v18 = vsel %vm796_vm1, %v1289_v12, 0.0 }
 0x1f9   : > { %v839_v17 = vadd.f32 %v838_v16, %v837_v14  ;;  %1290 = vlog2.f32 %v848_v15 }
 0x1fb   : > { %v841_v21 = vadd.f32 %v840_v18, %v839_v17 }
 0x1fd   : > { %1292 = vlog2.f32 %v841_v21 }
 0x206   : > { %v1291_v42 = vpop.eup %1290 }
 0x207   : > { %v852_v26 = vmul.f32 0.6931472, %v1291_v42 }
 0x209   : > { %v854_v46 = vadd.f32 %v852_v26, %v1692_v41  ;;  %v907_v41 = vsel %vm796_vm1, %v1130_v37, 0.0 }
 0x20a   : > { %v1293_v47 = vpop.eup %1292  ;;  %v909_v62 = vadd.f32 %v908_v60, %v907_v41 }
 0x20b   : > { %v850_v50 = vmul.f32 0.6931472, %v1293_v47  ;;  %v892_v51 = vsub.f32 %v854_v46, %v884_v30 }
 0x20d   : > { %v853_v54 = vadd.f32 %v850_v50, %v1702_v48  ;;  %v894_v56 = vmul.f32 %v1131_v52, %v892_v51 }
 0x20f   : > { %v891_v55 = vsub.f32 %v853_v54, %v877_v53  ;;  %v896_v59 = vsel %vm796_vm1, %v894_v56, 0.0 }
 0x211   : > { %v893_v57 = vmul.f32 %v1130_v37, %v891_v55 }
 0x213   : > { %v895_v58 = vsel %vm796_vm1, %v893_v57, 0.0 }
 0x214   : > { %v897_v61 = vadd.f32 %v896_v59, %v895_v58 }
 0x216   : > { %898 = vadd.xlane.f32.xlu0 %v897_v61 }
 0x21a   : > { %910 = vadd.xlane.f32.xlu0 %v909_v62 }
 0x29f   : > { %v899_v63 = vpop.xlane.xlu0 %898 }
 0x2a0   : > { %v900_v0 = vrot.slane %v899_v63, 4 }
 0x2a2   : > { %v901_v48 = vadd.f32 %v900_v0, %v899_v63 }
 0x2a3   : > { %v911_v1 = vpop.xlane.xlu0 %910 }
 0x2a4   : > { %v902_v2 = vrot.slane %v901_v48, 2  ;;  %v912_v3 = vrot.slane %v911_v1, 4 }
 0x2a6   : > { %v913_v4 = vadd.f32 %v912_v3, %v911_v1  ;;  %v903_v5 = vadd.f32 %v902_v2, %v901_v48 }
 0x2a8   : > { %v914_v6 = vrot.slane %v913_v4, 2  ;;  %v904_v7 = vrot.slane %v903_v5, 1 }
 0x2aa   : > { %v915_v8 = vadd.f32 %v914_v6, %v913_v4  ;;  %v905_v9 = vadd.f32 %v904_v7, %v903_v5 }
 0x2ac   : > { %1195 = vpush %v905_v9  ;;  %v916_v10 = vrot.slane %v915_v8, 1 }
 0x2ae   : > { %v917_v11 = vadd.f32 %v916_v10, %v915_v8 }
 0x2b0   : > { %1197 = vpush %v917_v11 }
 0x2dd   : > { %s1196_s0 = spop %1195 }
 0x2de   : > { %v919_v12 = vstv %s1196_s0 }
 0x2df   : > { %920 = vst [vmem:[%s321_s28] sm:$0x1] %v919_v12 }
 0x2e0   : > { %1363 = shalt.err (!%p1360_p7)
}
 0x2e1   : > { %s1364_s15 = scalar_lea.hbm %s1754_s25, 16  ;;  %s1368_s28 = scalar_lea.hbm %s1832_s4, 32 }
 0x2e2   : > { %p1365_p1 = scmp.ne.s32.totalorder %s1754_s25, %s1364_s15  ;;  %p1369_p3 = scmp.lt.s32.totalorder %s1754_s25, %s1832_s4 }
 0x2e3   : > { %p1370_p8 = scmp.lt.s32.totalorder %s1368_s28, %s1364_s15 }
 0x2e4   : > { %p1366_p10 = pnand %p1365_p1, %p1554_p9 }
 0x2e5   : > { %p1371_p0 = por %p1370_p8, %p1369_p3 }
 0x2e6   : > { %p1367_p13 = pneg %p1366_p10 }
 0x2e8   : > { %p1372_p2 = pnand %p1371_p0, %p1367_p13 }
 0x2ea   : > { %1375 = shalt.err (!%p1372_p2)
}
 0x2eb   : > { %1203 = dma.vmem_to_hbm [thread:$0]  (%p1554_p9), %s1756_s14, 16, %s1754_s25, %s924_s26  }
 0x2ec   : > { %s1198_s0 = spop %1197  ;;  %s953_s10 = scalar_lea.hbm %s1833_s5, %s1132_s29 }
 0x2ed   : > { %v921_v13 = vstv %s1198_s0  ;;  %s928_s11 = scalar_lea.sflag [#allocation10], %s1611_s9  ;;  %s1376_s15 = scalar_lea.vmem %s1758_s24, 16 }
 0x2ee   : > { %922 = vst [vmem:[%s327_s16] sm:$0x1] %v921_v13  ;;  %p1377_p5 = scmp.ne.s32.totalorder %s1758_s24, %s1376_s15  ;;  %s1472_s30 = smov [#allocation9]  }
 0x2ef   : > { %s1380_s27 = sshll.u32 %s1472_s30, 4  ;;  %s1381_s27 = int_to_ptr.vmem [resolvable:$false] %s1380_s27 }
 0x2f0   : > { %p1378_p6 = pnand %p1377_p5, %p1554_p9  ;;  %s1382_s28 = scalar_lea.vmem %s1381_s27, 32 }
 0x2f1   : > { %p1383_p7 = scmp.lt.s32.totalorder %s1758_s24, %s1381_s27  ;;  %p1384_p1 = scmp.lt.s32.totalorder %s1382_s28, %s1376_s15 }
 0x2f2   : > { %p1379_p4 = pneg %p1378_p6 }
 0x2f3   : > { %p1385_p10 = por %p1384_p1, %p1383_p7 }
 0x2f5   : > { %p1386_p13 = pnand %p1385_p10, %p1379_p4 }
 0x2f7   : > { %1389 = shalt.err (!%p1386_p13)
}
 0x2f8   : > { %s1390_s21 = scalar_lea.hbm %s953_s10, 16  ;;  %s1394_s14 = scalar_lea.hbm %s1833_s5, 32 }
 0x2f9   : > { %p1391_p3 = scmp.ne.s32.totalorder %s953_s10, %s1390_s21  ;;  %p1395_p2 = scmp.lt.s32.totalorder %s953_s10, %s1833_s5 }
 0x2fa   : > { %p1396_p5 = scmp.lt.s32.totalorder %s1394_s14, %s1390_s21 }
 0x2fb   : > { %p1392_p8 = pnand %p1391_p3, %p1554_p9 }
 0x2fc   : > { %p1397_p6 = por %p1396_p5, %p1395_p2 }
 0x2fd   : > { %p1393_p0 = pneg %p1392_p8 }
 0x2ff   : > { %p1398_p12 = pnand %p1397_p6, %p1393_p0 }
 0x301   : > { %1401 = shalt.err (!%p1398_p12)
}
 0x302   : > { %1204 = dma.vmem_to_hbm [thread:$0]  (%p1554_p9), %s1758_s24, 16, %s953_s10, %s928_s11  }
 0x303 PF: > { %s967_s26 = sand.u32 1, %s1444_s18   ;;  %p1845_p4 = scmp.ge.s32.totalorder %s1464_s23, 2 }
 0x304   : > { %s968_s12 = scalar_lea.sflag [#allocation5], %s967_s26 }
 0x305   : > { %p1215_p7 = pnand %p1845_p4, %p1561_p11 }
 0x307   : > { %p1216_p1 = pneg %p1215_p7 }
 0x309   : > { %1435 = dma.done.wait (%p1216_p1), %s968_s12, 16  }
 0x30a   : > { %1437 = vsyncadd (%p1216_p1), %s968_s12, 4294967280  ;;  %s976_s13 = scalar_lea.sflag [#allocation10], %s967_s26 }
 0x30b   : > { %1439 = dma.done.wait (%p1216_p1), %s976_s13, 16  }
 0x30c   : > { %1441 = vsyncadd (%p1216_p1), %s976_s13, 4294967280  ;;  %s28_s23 = sadd.s32 1, %s1464_s23   ;;  %s1846_s6 = sld [smem:[#allocation16_spill]] }
 0x30d   : > { %p25_p12 = scmp.ge.s32.totalorder %s28_s23, 4   ;;  %s1847_s24 = sld [smem:[#allocation15_spill]] }
 0x30e   : > { %s1848_s18 = smov %s1448_s19  ;;  %s1849_s19 = smov %s1452_s20 }
 0x30f   : > { %s1851_s21 = smov %s1460_s22  ;;  %27 = sbr.rel (!%p25_p12) target bundleno = 12 (0xc), region = 114 }
 0x312   : > { %s1850_s20 = smov %s1846_s6 }
 0x313   : > { %s1852_s22 = smov %s1847_s24 }
 0x314   :  { %980 = vsyncpa [#allocation4], 1 }
 0x315   :  { %982 = vsyncpa [#allocation4 + $0x1], 1 }
 0x316   :  { %983 = vsyncpa [#allocation7], 1 }
 0x317   :  { %985 = vsyncpa [#allocation7 + $0x1], 1 }
 0x318   :  { %986 = vsyncpa [#allocation5], 1 }
 0x319   :  { %988 = vsyncpa [#allocation5 + $0x1], 1 }
 0x31a   :  { %989 = vsyncpa [#allocation10], 1 }
 0x31b   :  { %991 = vsyncpa [#allocation10 + $0x1], 1 }

</bundles_post_ra>
